<compile_context>
chip_gen: v5e
topology: v5e:2x2
jax: 0.10.0
libtpu: 0.0.40
codegen_flags: <defaults>
</compile_context>

<pallas_src>
import functools
import math

import jax
import jax.numpy as jnp
from jax.experimental import pallas as pl
from jax.experimental.pallas import tpu as pltpu


# ---------------------------------------------------------------------------
# Kernel 1: node scores   score[i] = tanh( sum_c x[i, c] * w_hat[c] )
# ---------------------------------------------------------------------------
def _score_kernel(x_ref, w_ref, s_ref):
    # (1, C) @ (TILE_N, C)^T on the MXU -> (1, TILE_N).
    # The result is produced directly in lane-dense row layout, so the store is
    # a full unmasked vst and the HBM writeback is one contiguous TILE_N*4B DMA.
    s = jax.lax.dot_general(
        w_ref[...], x_ref[...],
        dimension_numbers=(((1,), (1,)), ((), ())),
        preferred_element_type=jnp.float32,
    )
    s_ref[...] = jnp.tanh(s)


def topk_pool_scores(x, w_hat, *, max_tile_rows=1024, per_block_bytes=2 << 20):
    """tanh(x @ w_hat) for all N nodes, tiled & pipelined over the node dim."""
    n, c = x.shape
    # Largest 128-multiple row tile whose x-block stays inside a conservative
    # per-block budget (double-buffered by the Pallas pipeline) -> safe on
    # v5e (16 MiB scoped default), v6e (32 MiB) and v7x (64 MiB physical VMEM).
    cap = max(128, min(max_tile_rows, (per_block_bytes // (c * 4)) // 128 * 128))
    tile_n = n if n <= cap else cap          # small N: single full-array block
    num_tiles = pl.cdiv(n, tile_n)

    out = pl.pallas_call(
        _score_kernel,
        grid=(num_tiles,),
        in_specs=[
            pl.BlockSpec((tile_n, c), lambda i: (i, 0)),   # node tile (pipelined)
            pl.BlockSpec((1, c), lambda i: (0, 0)),        # w_hat (resident)
        ],
        # lane-dense score row: block (1, tile_n) of a (1, num_tiles*tile_n) slab
        out_specs=pl.BlockSpec((1, tile_n), lambda i: (0, i)),
        out_shape=jax.ShapeDtypeStruct((1, num_tiles * tile_n), jnp.float32),
        compiler_params=pltpu.CompilerParams(
            dimension_semantics=("parallel",),   # v7x: shard node tiles over 2 TCs
        ),
    )(x, w_hat.reshape(1, c))
    return out[0, :n]                                       # (N,)


# ---------------------------------------------------------------------------
# Kernel 2: fused gather + scale
#   for graph g: out[g, j, :] = x[g, idx[g, j], :] * score_sel[g, j]
# ---------------------------------------------------------------------------
def _gather_scale_kernel(idx_ref, val_ref, x_ref, o_ref, *, k):
    g = pl.program_id(0)

    def body(j, carry):
        row = idx_ref[g, j]                                  # SMEM scalar (local id)
        o_ref[pl.ds(j, 1), :] = x_ref[pl.ds(row, 1), :] * val_ref[g, j]
        return carry

    jax.lax.fori_loop(0, k, body, 0, unroll=min(k, 8))


def gather_scale(x3, topi, topv):
    """x3: (G, nodes_per_graph, C);  topi/topv: (G, k) int32/f32 -> (G, k, C)."""
    g, npg, c = x3.shape
    k = topi.shape[1]
    # TODO(synk): for very large per-graph node counts the (npg, C) block should
    # itself be tiled; fine for typical graph-pooling sizes.
    grid_spec = pltpu.PrefetchScalarGridSpec(
        num_scalar_prefetch=2,                               # topi, topv -> SMEM
        grid=(g,),
        in_specs=[pl.BlockSpec((None, npg, c), lambda gi, idx, val: (gi, 0, 0))],
        out_specs=pl.BlockSpec((None, k, c), lambda gi, idx, val: (gi, 0, 0)),
    )
    return pl.pallas_call(
        functools.partial(_gather_scale_kernel, k=k),
        grid_spec=grid_spec,
        out_shape=jax.ShapeDtypeStruct((g, k, c), x3.dtype),
        compiler_params=pltpu.CompilerParams(dimension_semantics=("parallel",)),
    )(topi, topv, x3)


# ---------------------------------------------------------------------------
# Jittable forward (no host syncs; num_graphs / k are static)
# ---------------------------------------------------------------------------
@functools.partial(jax.jit, static_argnames=("num_graphs", "k"))
def _topk_pool_forward(w_hat, x, edge_index, batch, *, num_graphs, k):
    n, c = x.shape
    npg = n // num_graphs

    # ---- node scores (Pallas, tiled over nodes) ----
    score = topk_pool_scores(x, w_hat)                                   # (N,)

    # ---- per-graph top-k (no full sort) ----
    topv, topi = jax.lax.top_k(score.reshape(num_graphs, npg), k)        # (G, k)
    perm = (topi + (jnp.arange(num_graphs, dtype=jnp.int32) * npg)[:, None]
            ).reshape(-1)                                                # (G*k,)

    # ---- fused gather + scale (Pallas, scalar-prefetched indices/scores) ----
    x_out = gather_scale(
        x.reshape(num_graphs, npg, c), topi.astype(jnp.int32), topv
    ).reshape(num_graphs * k, c)
    batch_out = batch[perm]
    score_sel = topv.reshape(-1)

    # ---- filter_adj: keep edges with both endpoints kept, relabel ----
    kk = num_graphs * k
    keep_mask = jnp.zeros((n,), dtype=bool).at[perm].set(True)
    new_idx = jnp.zeros((n,), dtype=jnp.int32).at[perm].set(
        jnp.arange(kk, dtype=jnp.int32))
    row, col = edge_index[0], edge_index[1]
    edge_keep = keep_mask[row] & keep_mask[col]
    e = row.shape[0]
    # fixed-capacity compaction: kept edges packed to the front, rest -> -1
    pos = jnp.where(edge_keep, jnp.cumsum(edge_keep) - 1, e)   # dropped -> OOB
    edge_index_out = jnp.full((2, e), -1, dtype=jnp.int32)
    edge_index_out = edge_index_out.at[0, pos].set(new_idx[row], mode="drop")
    edge_index_out = edge_index_out.at[1, pos].set(new_idx[col], mode="drop")

    return x_out, edge_index_out, batch_out, perm, score_sel


class GraphPoolTopK:
    """JAX/Pallas port of GRAPH_POOL(type='topkpool', in_channels, poolratio)."""

    def __init__(self, in_channels, poolratio, key):
        self.in_channels = in_channels
        self.ratio = poolratio
        # PyG TopKPooling weight: (1, in_channels), uniform(-1/sqrt(C), 1/sqrt(C)).
        bound = 1.0 / math.sqrt(in_channels)
        w = jax.random.uniform(key, (in_channels,), jnp.float32,
                               minval=-bound, maxval=bound)
        # Fold the 1/||w|| normalisation into the parameter once (host side);
        # the kernel never recomputes the norm / rsqrt per tile.
        self.w_hat = w / jnp.sqrt(jnp.sum(w * w))

    def __call__(self, x, edge_index, batch, num_graphs):
        n = x.shape[0]
        assert n % num_graphs == 0, "equal-size graphs assumed (static shapes)"
        k = int(math.ceil(self.ratio * (n // num_graphs)))
        x_out, ei_out, batch_out, perm, score_sel = _topk_pool_forward(
            self.w_hat, x, edge_index, batch, num_graphs=num_graphs, k=k)
        # (x, edge_index, edge_attr, batch, perm, score[perm]) like PyG TopKPooling.
        # edge_index_out is (2, E) with -1 padding after the kept edges (jittable).
        return x_out, ei_out, None, batch_out, perm, score_sel


# ---------------------------------------------------------------------------
# Demo / smoke test
# ---------------------------------------------------------------------------
if __name__ == "__main__":
    key = jax.random.PRNGKey(0)
    k_w, k_x = jax.random.split(key)

    in_channels = 32
    poolratio = 0.5
    num_graphs = 2
    nodes_per_graph = 8
    n_nodes = num_graphs * nodes_per_graph

    x = jax.random.normal(k_x, (n_nodes, in_channels), jnp.float32)

    # Two independent ring graphs, bidirectional edges
    src, dst = [], []
    for g in range(num_graphs):
        off = g * nodes_per_graph
        for i in range(nodes_per_graph):
            a, b = off + i, off + (i + 1) % nodes_per_graph
            src += [a, b]
            dst += [b, a]
    edge_index = jnp.array([src, dst], dtype=jnp.int32)              # (2, E)
    batch = jnp.repeat(jnp.arange(num_graphs, dtype=jnp.int32), nodes_per_graph)

    pool = GraphPoolTopK(in_channels, poolratio, k_w)
    x_out, ei_out, _, batch_out, perm, score_sel = pool(x, edge_index, batch,
                                                        num_graphs)
    jax.block_until_ready((x_out, ei_out, batch_out, perm, score_sel))

    k = math.ceil(poolratio * nodes_per_graph)
    assert x_out.shape == (num_graphs * k, in_channels)

    # --- correctness checks vs. pure-JAX reference ---
    # fused gather+scale kernel: exact
    assert jnp.allclose(x_out, x[perm] * score_sel[:, None], atol=1e-5, rtol=1e-5)
    # score kernel values at the selected nodes (loose tol: MXU vs VPU reduction)
    score_ref = jnp.tanh(jnp.sum(x[perm] * pool.w_hat, axis=-1))
    assert jnp.allclose(score_sel, score_ref, atol=5e-2)
    # edge filtering / relabeling
    keep_mask = jnp.zeros((n_nodes,), bool).at[perm].set(True)
    keep_e = keep_mask[edge_index[0]] & keep_mask[edge_index[1]]
    n_kept = int(keep_e.sum())
    expected_edges = edge_index[:, keep_e]
    got_edges = ei_out[:, :n_kept]
    assert bool((perm[got_edges] == expected_edges).all())
    assert bool((ei_out[:, n_kept:] == -1).all())

    print("KERNEL_OK")
</pallas_src>

<mosaic_0001>
module attributes {stable_mosaic.version = 11 : i64} {
  func.func @_score_kernel(%arg0: i32, %arg1: memref<16x32xf32, #tpu.memory_space<vmem>>, %arg2: memref<1x32xf32, #tpu.memory_space<vmem>>, %arg3: memref<1x16xf32, #tpu.memory_space<vmem>>) attributes {dimension_semantics = [#tpu.dimension_semantics<parallel>], iteration_bounds = array<i64: 1>, scalar_prefetch = 0 : i64, scratch_operands = 0 : i64, tpu.core_type = #tpu.core_type<tc>, window_params = [{transform_indices = @transform_0, window_bounds = array<i64: 16, 32>}, {pipeline_mode = #tpu.pipeline_mode<synchronous>, transform_indices = @transform_1, window_bounds = array<i64: 1, 32>}, {transform_indices = @transform_2, window_bounds = array<i64: 1, 16>}]} {
    %c0 = arith.constant 0 : index
    %c0_0 = arith.constant 0 : index
    %0 = vector.load %arg2[%c0, %c0_0] : memref<1x32xf32, #tpu.memory_space<vmem>>, vector<1x32xf32>
    %c0_1 = arith.constant 0 : index
    %c0_2 = arith.constant 0 : index
    %1 = vector.load %arg1[%c0_1, %c0_2] : memref<16x32xf32, #tpu.memory_space<vmem>>, vector<16x32xf32>
    %cst = arith.constant dense<0.000000e+00> : vector<1x16xf32>
    %2 = tpu.matmul %0, %1, %cst {dimension_numbers = #tpu.dot_dimension_numbers<[1], [1], [0], [0], [0, 0, 1, 0], [], []>} : vector<1x32xf32>, vector<16x32xf32>, vector<1x16xf32> -> vector<1x16xf32>
    %3 = math.tanh %2 : vector<1x16xf32>
    %c0_3 = arith.constant 0 : index
    %c0_4 = arith.constant 0 : index
    %4 = vector.load %arg3[%c0_3, %c0_4] : memref<1x16xf32, #tpu.memory_space<vmem>>, vector<1x16xf32>
    tpu.vector_store %arg3[%c0_3, %c0_4], %3 {strides = array<i32>} : memref<1x16xf32, #tpu.memory_space<vmem>>, vector<1x16xf32>,
    return
  }
  func.func @transform_0(%arg0: i32) -> (i32, i32) {
    %c0_i32 = arith.constant 0 : i32
    %c0_i32_0 = arith.constant 0 : i32
    return %arg0, %c0_i32 : i32, i32
  }
  func.func @transform_1(%arg0: i32) -> (i32, i32) {
    %c0_i32 = arith.constant 0 : i32
    %c0_i32_0 = arith.constant 0 : i32
    %c0_i32_1 = arith.constant 0 : i32
    return %c0_i32, %c0_i32_0 : i32, i32
  }
  func.func @transform_2(%arg0: i32) -> (i32, i32) {
    %c0_i32 = arith.constant 0 : i32
    %c0_i32_0 = arith.constant 0 : i32
    return %c0_i32, %arg0 : i32, i32
  }
}

module attributes {stable_mosaic.version = 11 : i64} {
  func.func @_gather_scale_kernel(%arg0: i32, %arg1: memref<2x4xi32, #tpu.memory_space<smem>>, %arg2: memref<2x4xf32, #tpu.memory_space<smem>>, %arg3: memref<1x8x32xf32, #tpu.memory_space<vmem>>, %arg4: memref<1x4x32xf32, #tpu.memory_space<vmem>>) attributes {dimension_semantics = [#tpu.dimension_semantics<parallel>], iteration_bounds = array<i64: 2>, scalar_prefetch = 2 : i64, scratch_operands = 0 : i64, tpu.core_type = #tpu.core_type<tc>, window_params = [{transform_indices = @transform_0, window_bounds = array<i64: 1, 8, 32>}, {transform_indices = @transform_1, window_bounds = array<i64: 1, 4, 32>}]} {
    %c0_i32 = arith.constant 0 : i32
    %0 = arith.index_cast %arg0 : i32 to index
    %1 = arith.index_cast %c0_i32 : i32 to index
    %2 = memref.load %arg1[%0, %1] : memref<2x4xi32, #tpu.memory_space<smem>>
    %c0 = arith.constant 0 : index
    %3 = arith.index_cast %2 : i32 to index
    %c0_0 = arith.constant 0 : index
    %4 = vector.load %arg3[%c0, %3, %c0_0] : memref<1x8x32xf32, #tpu.memory_space<vmem>>, vector<1x1x32xf32>
    %5 = vector.shape_cast %4 : vector<1x1x32xf32> to vector<1x32xf32>
    %6 = arith.index_cast %arg0 : i32 to index
    %7 = arith.index_cast %c0_i32 : i32 to index
    %8 = memref.load %arg2[%6, %7] : memref<2x4xf32, #tpu.memory_space<smem>>
    %9 = vector.broadcast %8 : f32 to vector<1x32xf32>
    %10 = arith.mulf %5, %9 : vector<1x32xf32>
    %c0_1 = arith.constant 0 : index
    %11 = arith.index_cast %c0_i32 : i32 to index
    %c0_2 = arith.constant 0 : index
    %12 = vector.load %arg4[%c0_1, %11, %c0_2] : memref<1x4x32xf32, #tpu.memory_space<vmem>>, vector<1x1x32xf32>
    %13 = vector.shape_cast %12 : vector<1x1x32xf32> to vector<1x32xf32>
    %14 = vector.shape_cast %10 : vector<1x32xf32> to vector<1x1x32xf32>
    tpu.vector_store %arg4[%c0_1, %11, %c0_2], %14 {strides = array<i32>} : memref<1x4x32xf32, #tpu.memory_space<vmem>>, vector<1x1x32xf32>,
    %c1_i32 = arith.constant 1 : i32
    %15 = arith.index_cast %arg0 : i32 to index
    %16 = arith.index_cast %c1_i32 : i32 to index
    %17 = memref.load %arg1[%15, %16] : memref<2x4xi32, #tpu.memory_space<smem>>
    %c0_3 = arith.constant 0 : index
    %18 = arith.index_cast %17 : i32 to index
    %c0_4 = arith.constant 0 : index
    %19 = vector.load %arg3[%c0_3, %18, %c0_4] : memref<1x8x32xf32, #tpu.memory_space<vmem>>, vector<1x1x32xf32>
    %20 = vector.shape_cast %19 : vector<1x1x32xf32> to vector<1x32xf32>
    %21 = arith.index_cast %arg0 : i32 to index
    %22 = arith.index_cast %c1_i32 : i32 to index
    %23 = memref.load %arg2[%21, %22] : memref<2x4xf32, #tpu.memory_space<smem>>
    %24 = vector.broadcast %23 : f32 to vector<1x32xf32>
    %25 = arith.mulf %20, %24 : vector<1x32xf32>
    %c0_5 = arith.constant 0 : index
    %26 = arith.index_cast %c1_i32 : i32 to index
    %c0_6 = arith.constant 0 : index
    %27 = vector.load %arg4[%c0_5, %26, %c0_6] : memref<1x4x32xf32, #tpu.memory_space<vmem>>, vector<1x1x32xf32>
    %28 = vector.shape_cast %27 : vector<1x1x32xf32> to vector<1x32xf32>
    %29 = vector.shape_cast %25 : vector<1x32xf32> to vector<1x1x32xf32>
    tpu.vector_store %arg4[%c0_5, %26, %c0_6], %29 {strides = array<i32>} : memref<1x4x32xf32, #tpu.memory_space<vmem>>, vector<1x1x32xf32>,
    %c2_i32 = arith.constant 2 : i32
    %30 = arith.index_cast %arg0 : i32 to index
    %31 = arith.index_cast %c2_i32 : i32 to index
    %32 = memref.load %arg1[%30, %31] : memref<2x4xi32, #tpu.memory_space<smem>>
    %c0_7 = arith.constant 0 : index
    %33 = arith.index_cast %32 : i32 to index
    %c0_8 = arith.constant 0 : index
    %34 = vector.load %arg3[%c0_7, %33, %c0_8] : memref<1x8x32xf32, #tpu.memory_space<vmem>>, vector<1x1x32xf32>
    %35 = vector.shape_cast %34 : vector<1x1x32xf32> to vector<1x32xf32>
    %36 = arith.index_cast %arg0 : i32 to index
    %37 = arith.index_cast %c2_i32 : i32 to index
    %38 = memref.load %arg2[%36, %37] : memref<2x4xf32, #tpu.memory_space<smem>>
    %39 = vector.broadcast %38 : f32 to vector<1x32xf32>
    %40 = arith.mulf %35, %39 : vector<1x32xf32>
    %c0_9 = arith.constant 0 : index
    %41 = arith.index_cast %c2_i32 : i32 to index
    %c0_10 = arith.constant 0 : index
    %42 = vector.load %arg4[%c0_9, %41, %c0_10] : memref<1x4x32xf32, #tpu.memory_space<vmem>>, vector<1x1x32xf32>
    %43 = vector.shape_cast %42 : vector<1x1x32xf32> to vector<1x32xf32>
    %44 = vector.shape_cast %40 : vector<1x32xf32> to vector<1x1x32xf32>
    tpu.vector_store %arg4[%c0_9, %41, %c0_10], %44 {strides = array<i32>} : memref<1x4x32xf32, #tpu.memory_space<vmem>>, vector<1x1x32xf32>,
    %c3_i32 = arith.constant 3 : i32
    %45 = arith.index_cast %arg0 : i32 to index
    %46 = arith.index_cast %c3_i32 : i32 to index
    %47 = memref.load %arg1[%45, %46] : memref<2x4xi32, #tpu.memory_space<smem>>
    %c0_11 = arith.constant 0 : index
    %48 = arith.index_cast %47 : i32 to index
    %c0_12 = arith.constant 0 : index
    %49 = vector.load %arg3[%c0_11, %48, %c0_12] : memref<1x8x32xf32, #tpu.memory_space<vmem>>, vector<1x1x32xf32>
    %50 = vector.shape_cast %49 : vector<1x1x32xf32> to vector<1x32xf32>
    %51 = arith.index_cast %arg0 : i32 to index
    %52 = arith.index_cast %c3_i32 : i32 to index
    %53 = memref.load %arg2[%51, %52] : memref<2x4xf32, #tpu.memory_space<smem>>
    %54 = vector.broadcast %53 : f32 to vector<1x32xf32>
    %55 = arith.mulf %50, %54 : vector<1x32xf32>
    %c0_13 = arith.constant 0 : index
    %56 = arith.index_cast %c3_i32 : i32 to index
    %c0_14 = arith.constant 0 : index
    %57 = vector.load %arg4[%c0_13, %56, %c0_14] : memref<1x4x32xf32, #tpu.memory_space<vmem>>, vector<1x1x32xf32>
    %58 = vector.shape_cast %57 : vector<1x1x32xf32> to vector<1x32xf32>
    %59 = vector.shape_cast %55 : vector<1x32xf32> to vector<1x1x32xf32>
    tpu.vector_store %arg4[%c0_13, %56, %c0_14], %59 {strides = array<i32>} : memref<1x4x32xf32, #tpu.memory_space<vmem>>, vector<1x1x32xf32>,
    %c4_i32 = arith.constant 4 : i32
    return
  }
  func.func @transform_0(%arg0: i32, %arg1: memref<2x4xi32, #tpu.memory_space<smem>>, %arg2: memref<2x4xf32, #tpu.memory_space<smem>>) -> (i32, i32, i32) {
    %c0_i32 = arith.constant 0 : i32
    %c0_i32_0 = arith.constant 0 : i32
    %c0_i32_1 = arith.constant 0 : i32
    return %arg0, %c0_i32, %c0_i32_0 : i32, i32, i32
  }
  func.func @transform_1(%arg0: i32, %arg1: memref<2x4xi32, #tpu.memory_space<smem>>, %arg2: memref<2x4xf32, #tpu.memory_space<smem>>) -> (i32, i32, i32) {
    %c0_i32 = arith.constant 0 : i32
    %c0_i32_0 = arith.constant 0 : i32
    %c0_i32_1 = arith.constant 0 : i32
    return %arg0, %c0_i32, %c0_i32_0 : i32, i32, i32
  }
}

</mosaic_0001>

<bundles_post_ra>
// kernel: squeeze.3
= control target key start
LH: loop header
LB: loop body
LE: loop exit
PB: predicated region body
PF: predicated region fallthrough
CT: control target
= control target key end

     0   :  { %vm7_vm0 = vcmask 64512   ;;  %s39_s0 = inlined_call_operand.vmem [shape: f32[16], index: 0, kind: input, shape index: {}]   ;;  %s40_s1 = inlined_call_operand.vmem [shape: f32[2,8], index: 1, kind: output, shape index: {}]  }
   0x1   :  { %v4_v0 = vld [vmem:[%s39_s0] sm:$0x1]  ;;  %s22_s0 = smov 120  }
   0x2   :  { %5 = vst [vmem:[#allocation1] sm:$0x1] %v4_v0 }
   0x9   :  { %v9_v1 = vld [vmem:[#allocation1] sm:$0x1]  }
   0xa   :  { %v6_v2 = vld [vmem:[#allocation1] sm:$0x1]   ;;  %10 = vrot.lane.b32.xlu0 %v9_v1, %s22_s0 }
   0xb   :  { %8 = vst.msk [vmem:[#allocation0] sm:$0x1] %vm7_vm0, %v6_v2  }
  0x7c   :  { %v11_v3 = vpop.permute.xlu0 %10  }
  0x7d   :  { %14 = vst.msk [vmem:[#allocation0 + $0x1] sm:$0x1] %vm7_vm0, %v11_v3  }
  0x84   :  { %v17_v4 = vld [vmem:[#allocation0] sm:$0x3] }
  0x85   :  { %20 = vst [vmem:[%s40_s1] sm:$0x3] %v17_v4 }

// kernel: _topk_pool_forward.3
= control target key start
LH: loop header
LB: loop body
LE: loop exit
PB: predicated region body
PF: predicated region fallthrough
CT: control target
= control target key end

     0   :  { %s381_s18 = smov [#allocation3]   ;;  %s382_s19 = smov [#allocation4]   ;;  %s509_s0 = inlined_call_operand.vmem [shape: s32[2,4], index: 0, kind: input, shape index: {}]   ;;  %s510_s2 = inlined_call_operand.vmem [shape: f32[2,8,32], index: 2, kind: input, shape index: {}]   ;;  %s511_s3 = inlined_call_operand.hbm [shape: f32[2,4,32], index: 3, kind: output, shape index: {}]   ;;  %s512_s1 = inlined_call_operand.vmem [shape: f32[2,4], index: 1, kind: input, shape index: {}]  }
   0x1   :  { %s9_s14 = sshll.u32 %s509_s0, 4  ;;  %s14_s17 = sshll.u32 %s512_s1, 4  ;;  %s10_s14 = int_to_ptr.vmem [resolvable:$true] %s9_s14  ;;  %s15_s17 = int_to_ptr.vmem [resolvable:$true] %s14_s17 }
   0x2   :  { %12 = dma.vmem_to_smem %s10_s14, 32, %s381_s18, [#allocation2] }
   0x3   :  { %17 = dma.vmem_to_smem %s15_s17, 32, %s382_s19, [#allocation2] }
   0x4   :  { %359 = dma.done.wait [#allocation2], 64 }
   0x5   :  { %360 = vsyncadd [#allocation2], 4294967232 }
   0x6   :  { %20 = sfence }
   0x7   :  { %21 = vsyncpa [#allocation6], 0 }
   0x8   :  { %23 = vsyncpa [#allocation6 + $0x1], 0  ;;  %s409_s20 = smov 0   ;;  %s411_s21 = smov 0  }
   0x9   :  { %s413_s0 = smov 0   ;;  %s415_s22 = smov 0  }
   0xa LB: > { %s430_s1 = sadd.s32 4294967295, %s379_s22   ;;  %s239_s23 = sadd.s32 4294967294, %s379_s22   ;;  %s379_s22 = sphi %s415_s22, %s520_s22   ;;  %s375_s0 = sphi %s413_s0, %s519_s0   ;;  %s371_s21 = sphi %s411_s21, %s518_s21   ;;  %s367_s20 = sphi %s409_s20, %s517_s20  }
   0xb   : > { %s434_s24 = sadd.s32 1, %s379_s22   ;;  %s62_s25 = sadd.s32 1, %s375_s0 }
   0xc   : > { %s59_s26 = ssub.s32 %s379_s22, %s434_s24  ;;  %p72_p0 = scmp.ne.s32.totalorder %s375_s0, %s371_s21 }
   0xd   : > { %p60_p1 = scmp.eq.s32.totalorder %s59_s26, 0  ;;  %p73_p2 = scmp.eq.s32.totalorder %s430_s1, 1 }
   0xe   : > { %p78_p3 = scmp.ne.s32.totalorder %s371_s21, %s367_s20  ;;  %p79_p4 = scmp.eq.s32.totalorder %s239_s23, 1 }
   0xf   : > { %s445_s27 = scalar_select %p60_p1, %s375_s0, %s62_s25  }
  0x10   : > { %p447_p5 = por %p73_p2, %p72_p0  ;;  %p451_p6 = por %p79_p4, %p78_p3 }
  0x11   : > { %p242_p7 = scmp.ge.s32.totalorder %s379_s22, 1  ;;  %p104_p8 = scmp.lt.s32.totalorder %s379_s22, 3 }
  0x13   : > { %p105_p9 = pnand %p242_p7, %p104_p8 }
  0x14   : > { %s513_s30 = sand.u32 (!%p105_p9), 1, %s371_s21   ;;  %p123_p10 = scmp.lt.s32.totalorder (!%p105_p9), %s430_s1, 1 }
  0x15   : > { %108 = sbr.rel (%p105_p9) target bundleno = 47 (0x2f), region = 24  ;;  %s243_s4 = sshll.u32 (!%p105_p9), %s513_s30, 2 }
  0x16   : > { %s245_s5 = sshll.u32 (!%p105_p9), %s430_s1, 7  ;;  %s247_s26 = sshll.u32 (!%p105_p9), %s430_s1, 2 }
  0x17   : > { %s128_s6 = sld [smem:[#allocation3 + %s245_s5]] (!%p105_p9)  ;;  %s136_s10 = sadd.s32 (!%p105_p9), 1, %s245_s5 }
  0x18   : > { %s131_s8 = sld [smem:[#allocation4 + %s245_s5]] (!%p105_p9)  ;;  %s144_s16 = sadd.s32 (!%p105_p9), 2, %s245_s5 }
  0x19   : > { %s137_s14 = sld [smem:[#allocation3 + %s136_s10]] (!%p105_p9)  ;;  %s152_s23 = sadd.s32 (!%p105_p9), 3, %s245_s5 }
  0x1a   : > { %s124_s7 = scalar_select %p123_p10, %s430_s1, 1  ;;  %vm134_vm0 = vcmask 253952  }
  0x1b   : > { %s140_s15 = sld [smem:[#allocation4 + %s136_s10]]  ;;  %s171_s30 = scalar_lea.hbm %s511_s3, %s247_s26 }
  0x1c   : > { %s244_s9 = sshll.u32 %s124_s7, 3  ;;  %s145_s18 = sld [smem:[#allocation3 + %s144_s16]] }
  0x1d   : > { %s466_s13 = scalar_lea.vmem %s510_s2, %s244_s9  ;;  %s148_s19 = sld [smem:[#allocation4 + %s144_s16]] }
  0x1e   : > { %s129_s17 = scalar_lea.vmem %s466_s13, %s128_s6  ;;  %v132_v1 = vstv %s131_s8  ;;  %s153_s25 = sld [smem:[#allocation3 + %s152_s23]] }
  0x1f   : > { %v130_v0 = vld [vmem:[%s129_s17] sm:$0x1]  ;;  %s156_s7 = sld [smem:[#allocation4 + %s152_s23]]  ;;  %s138_s9 = scalar_lea.vmem %s466_s13, %s137_s14 }
  0x20   : > { %v133_v2 = vmul.f32 %v132_v1, %v130_v0  ;;  %s122_s10 = scalar_lea.vmem [#allocation5], %s243_s4  ;;  %v139_v3 = vld [vmem:[%s138_s9] sm:$0x1]  ;;  %s175_s1 = sshll.u32 %s171_s30, 4  ;;  %s176_s1 = int_to_ptr.hbm [resolvable:$true] %s175_s1 }
  0x21   : > { %v141_v4 = vstv %s140_s15  ;;  %s173_s6 = sshll.u32 %s122_s10, 4  ;;  %s516_s4 = sand.u32 1, %s371_s21   ;;  %s174_s6 = int_to_ptr.vmem [resolvable:$true] %s173_s6 }
  0x22   : > { %135 = vst.msk [vmem:[%s122_s10] sm:$0x1] %vm134_vm0, %v133_v2  ;;  %v142_v5 = vmul.f32 %v141_v4, %v139_v3  ;;  %s146_s5 = scalar_lea.vmem %s466_s13, %s145_s18  ;;  %s161_s14 = scalar_lea.sflag [#allocation6], %s516_s4 }
  0x23   : > { %v147_v6 = vld [vmem:[%s146_s5] sm:$0x1]  ;;  %v149_v7 = vstv %s148_s19  ;;  %s329_s15 = sshra.s32 %s176_s1, 4  ;;  %s335_s17 = scalar_lea.hbm %s511_s3, 8  ;;  %s330_s15 = int_to_ptr.hbm [resolvable:$true] %s329_s15 }
  0x24   : > { %143 = vst.msk [vmem:[%s122_s10 + $0x1] sm:$0x1] %vm134_vm0, %v142_v5  ;;  %v150_v8 = vmul.f32 %v149_v7, %v147_v6  ;;  %s154_s8 = scalar_lea.vmem %s466_s13, %s153_s25  ;;  %s331_s16 = scalar_lea.hbm %s330_s15, 4 }
  0x25   : > { %v155_v9 = vld [vmem:[%s154_s8] sm:$0x1]  ;;  %v157_v10 = vstv %s156_s7  ;;  %p332_p11 = scmp.ne.s32.totalorder %s330_s15, %s331_s16  ;;  %p336_p0 = scmp.lt.s32.totalorder %s330_s15, %s511_s3 }
  0x26   : > { %151 = vst.msk [vmem:[%s122_s10 + $0x2] sm:$0x1] %vm134_vm0, %v150_v8  ;;  %v158_v11 = vmul.f32 %v157_v10, %v155_v9  ;;  %p337_p1 = scmp.lt.s32.totalorder %s335_s17, %s331_s16 }
  0x27   : > { %p333_p12 = pnand %p332_p11, %p447_p5 }
  0x28   : > { %159 = vst.msk [vmem:[%s122_s10 + $0x3] sm:$0x1] %vm134_vm0, %v158_v11  ;;  %p338_p2 = por %p337_p1, %p336_p0 }
  0x29   : > { %p334_p13 = pneg %p333_p12 }
  0x2b   : > { %p339_p3 = pnand %p338_p2, %p334_p13 }
  0x2d   : > { %342 = shalt.err (!%p339_p3)
}
  0x2e   : > { %250 = dma.vmem_to_hbm [thread:$0]  (%p447_p5), %s174_s6, 64, %s176_s1, %s161_s14  }
  0x2f PF: > { %p256_p4 = scmp.ge.s32.totalorder %s379_s22, 2  ;;  %s187_s23 = sand.u32 1, %s367_s20  }
  0x30   : > { %s188_s25 = scalar_lea.sflag [#allocation6], %s187_s23 }
  0x31   : > { %p253_p7 = pnand %p256_p4, %p451_p6 }
  0x33   : > { %p254_p8 = pneg %p253_p7 }
  0x35   : > { %362 = dma.done.wait (%p254_p8), %s188_s25, 64  }
  0x36   : > { %364 = vsyncadd (%p254_p8), %s188_s25, 4294967232  ;;  %p26_p9 = scmp.ge.s32.totalorder %s434_s24, 4   ;;  %s517_s20 = smov %s371_s21 }
  0x37   : > { %s518_s21 = smov %s375_s0  ;;  %s519_s0 = smov %s445_s27 }
  0x38   : > { %s520_s22 = smov %s434_s24  ;;  %28 = sbr.rel (!%p26_p9) target bundleno = 10 (0xa), region = 63 }
  0x3d   :  { %194 = vsyncpa [#allocation6], 1 }
  0x3e   :  { %196 = vsyncpa [#allocation6 + $0x1], 1 }

// kernel: _topk_pool_forward.2
= control target key start
LH: loop header
LB: loop body
LE: loop exit
PB: predicated region body
PF: predicated region fallthrough
CT: control target
= control target key end

     0   :  { %7 = vsyncpa [#allocation3], 0  ;;  %s102_s12 = smov [#allocation2]   ;;  %s103_s14 = smov 128   ;;  %s129_s0 = inlined_call_operand.hbm [shape: f32[16,32], index: 0, kind: input, shape index: {}]   ;;  %s130_s1 = inlined_call_operand.vmem [shape: f32[1,32], index: 1, kind: input, shape index: {}]   ;;  %s131_s2 = inlined_call_operand.vmem [shape: f32[1,16], index: 2, kind: output, shape index: {}]  }
   0x1   :  { %s12_s11 = sshll.u32 %s129_s0, 4  ;;  %s14_s13 = sshll.u32 %s102_s12, 4  ;;  %s13_s11 = int_to_ptr.hbm [resolvable:$true] %s12_s11  ;;  %s15_s13 = int_to_ptr.vmem [resolvable:$true] %s14_s13 }
   0x2   :  { %s104_s15 = smov 8  }
   0x3   :  { %20 = dma.hbm_to_vmem [thread:$0]  %s13_s11, 256, %s15_s13, [#allocation3], %s103_s14, %s103_s14, %s104_s15  }
   0x4   :  { %100 = dma.done.wait [#allocation3], 256  }
   0x5   :  { %101 = vsyncadd [#allocation3], 4294967040  ;;  %vm30_vm0 = vcmask 261120   ;;  %v29_v0 = vld [vmem:[#allocation2 + $0x8] sm:$0xff]  ;;  %v28_v1 = vld [vmem:[#allocation2] sm:$0xff]  ;;  %vm61_vm1 = vcmask 122880  }
   0x6   :  { %68 = vmatpush.xpose.msk.msra.mxu0 %vm30_vm0, %v29_v0  ;;  %v27_v2 = vld [vmem:[%s130_s1] sm:$0x1] }
   0xa   :  { %69 = vmatpush.xpose.msk.msra.mxu0 %vm30_vm0, %v28_v1 }
   0xd   :  { %70 = vmatmul.msk.f32.vlgmr.msra.gmra.mxu0 %vm30_vm0, %v27_v2 }
  0x8a   :  { %v57_v3 = vpop.f32.mrf.mxu0 }
  0x8b   :  { %74 = vtanh.f32 %v57_v3 }
  0x91   :  { %v75_v4 = vpop.eup %74 }
  0x92   :  { %62 = vst.msk [vmem:[%s131_s2] sm:$0x1] %vm61_vm1, %v75_v4 }
  0x93   :  { %67 = vsyncpa [#allocation3], 1 }

</bundles_post_ra>
